<compile_context>
chip_gen: v7x
topology: tpu7x:2x2x1
jax: 0.10.0
libtpu: 0.0.40
codegen_flags: <defaults>
</compile_context>

<pallas_src>
import jax
import jax.numpy as jnp
import numpy as np
from jax import lax
from jax.experimental import pallas as pl
from jax.experimental.pallas import tpu as pltpu


def _hetero_attn_kernel(x_ref, m_ref, w_ref, b_ref, out_ref, a_ref):
    # x_ref:   (BB, N, D)   features, D lane-dense
    # m_ref:   (BB, H, N)   masks, PyTorch layout, N lane-dense (any dtype)
    # w_ref:   (H, D)       Linear weight (replicated across grid steps)
    # b_ref:   (H, 1)       Linear bias
    # out_ref: (BB, 1, D)   mean-over-heads output
    # a_ref:   (BB, H, N)   attention weights, PyTorch layout, N lane-dense
    x = x_ref[...]                       # native dtype; no upcast before the MXU
    bb, n, d = x.shape
    h = w_ref.shape[0]

    # ---- projection straight into the (BB, H, N) layout: one batched MXU call
    # contracting D on both operands; no transposes anywhere in the kernel. ----
    w_b = jnp.broadcast_to(w_ref[...], (bb, h, d))            # tiny; once per step
    scores = lax.dot_general(
        w_b, x,
        dimension_numbers=(((2,), (2,)), ((0,), (0,))),        # contract D, batch BB
        preferred_element_type=jnp.float32,
    ) + b_ref[...]                                             # (BB, H, N) f32

    # ---- mask + numerically-stable softmax over nodes (last axis, lane-dense) --
    # Fully-masked (batch, head) rows give a uniform softmax, matching the
    # PyTorch -9e15 trick (not zeros).
    keep = m_ref[...].astype(jnp.float32) > 0.5
    e = jnp.where(keep, scores, jnp.float32(-9.0e15))
    e_max = jnp.max(e, axis=-1, keepdims=True)                 # (BB, H, 1)
    p = jnp.exp(e - e_max)
    denom = jnp.sum(p, axis=-1, keepdims=True)                 # (BB, H, 1)
    inv = pl.reciprocal(denom, approx=True)                    # EUP slot, off the VPU
    inv = inv * (2.0 - denom * inv)                            # Newton step -> ~f32
    a = p * inv                                                # (BB, H, N) f32
    a_ref[...] = a.astype(a_ref.dtype)                         # lane-dense store

    # ---- out = mean_h(a_h @ x) == (mean_h a_h) @ x : folded head-mean ----
    a_mean = jnp.sum(a, axis=1, keepdims=True) * jnp.float32(1.0 / h)   # (BB, 1, N)
    out = lax.dot_general(
        a_mean, x,
        dimension_numbers=(((2,), (1,)), ((0,), (0,))),        # contract N, batch BB
        preferred_element_type=jnp.float32,
    )                                                          # (BB, 1, D)
    out_ref[...] = out.astype(out_ref.dtype)


def _pick_batch_block(B, N, D, H, x_isz, m_isz, a_isz, budget_bytes):
    """Largest divisor of B whose double-buffered tile footprint fits the budget,
    keeping BB*N rows in the ~512-1024 DMA sweet spot and guaranteeing >= 2 grid
    steps whenever B > 1 (so the 'parallel' axis can use both v7x TensorCores)."""
    divisors = [bb for bb in range(1, B + 1) if B % bb == 0]

    def step_bytes(bb):
        x_blk = bb * N * D * x_isz
        m_blk = bb * N * H * m_isz
        a_blk = bb * N * H * a_isz
        o_blk = bb * D * 4
        fixed = H * D * 4 + H * 4
        return 2 * (x_blk + m_blk + a_blk + o_blk + fixed)     # double-buffered

    fitting = [bb for bb in divisors if step_bytes(bb) <= budget_bytes] or [1]
    multi = [bb for bb in fitting if B // bb >= 2] or fitting  # >= 2 steps (v7x)
    sweet = [bb for bb in multi if bb * N <= 1024]
    return max(sweet) if sweet else min(multi)


def hetero_attention(x, masks, w, b, *, batch_block=None, a_dtype=jnp.float32,
                     vmem_limit_bytes=48 * 1024 * 1024):
    """x: (B, N, D); masks: (B, H, N) in any dtype (only `> 0.5` is used);
    w: (H, D); b: (H,).

    Returns (out, a):
      out = squeeze(mean over heads of a @ x)
      a   = softmax attention weights, shape (B, H, N), dtype `a_dtype`
            (pass jnp.bfloat16 at production sizes to halve that HBM stream).
    """
    B, N, D = x.shape
    H = w.shape[0]
    # TODO(synk): at production sizes pad N to a multiple of 128 wrapper-side
    # (with masked-out padding columns) so the `a` rows stay fully lane-dense.

    if batch_block is None:
        budget = max(vmem_limit_bytes - (8 << 20), 4 << 20)    # headroom for scratch
        batch_block = _pick_batch_block(
            B, N, D, H,
            x.dtype.itemsize, masks.dtype.itemsize,
            np.dtype(a_dtype).itemsize, budget)
    BB = batch_block
    assert B % BB == 0, "batch_block must divide B"

    b2 = b.reshape(H, 1)

    out3d, a = pl.pallas_call(
        _hetero_attn_kernel,
        out_shape=(
            jax.ShapeDtypeStruct((B, 1, D), jnp.float32),       # out (singleton mid
            jax.ShapeDtypeStruct((B, H, N), a_dtype),           #   dim keeps blocks
        ),                                                      #   layout-legal)
        grid_spec=pltpu.PrefetchScalarGridSpec(
            num_scalar_prefetch=0,
            grid=(B // BB,),
            in_specs=[
                pl.BlockSpec((BB, N, D), lambda i: (i, 0, 0)),  # x
                pl.BlockSpec((BB, H, N), lambda i: (i, 0, 0)),  # masks (PyTorch layout)
                pl.BlockSpec((H, D), lambda i: (0, 0)),         # W (replicated)
                pl.BlockSpec((H, 1), lambda i: (0, 0)),         # bias (replicated)
            ],
            out_specs=[
                pl.BlockSpec((BB, 1, D), lambda i: (i, 0, 0)),  # out
                pl.BlockSpec((BB, H, N), lambda i: (i, 0, 0)),  # a (PyTorch layout)
            ],
        ),
        compiler_params=pltpu.CompilerParams(
            dimension_semantics=("parallel",),
            vmem_limit_bytes=vmem_limit_bytes,
        ),
    )(x, masks, w, b2)

    out = jnp.squeeze(out3d)      # matches torch .squeeze(): drops all size-1 dims
    return out, a


def _reference(x, masks, w, b):
    # pure-JAX reference of the PyTorch forward
    q = jnp.einsum("bnd,hd->bnh", x, w) + b            # (B, N, H)
    q = jnp.transpose(q, (0, 2, 1))                    # (B, H, N)
    e = jnp.where(masks > 0.5, q, jnp.full_like(q, -9.0e15))
    a = jax.nn.softmax(e, axis=-1)
    out = jnp.einsum("bhn,bnd->bhd", a, x)
    out = jnp.mean(out, axis=1)
    return jnp.squeeze(out), a


if __name__ == "__main__":
    B, N, D, H = 2, 8, 32, 4

    key = jax.random.PRNGKey(0)
    kx, km, kw, kb = jax.random.split(key, 4)

    x = jax.random.normal(kx, (B, N, D), dtype=jnp.float32)
    # binary masks (~70% unmasked); bf16 halves the masks HBM stream and is
    # exact for 0/1 values (kernel only does a `> 0.5` compare on them).
    masks = (jax.random.uniform(km, (B, H, N)) > 0.3).astype(jnp.bfloat16)

    # deterministic Linear(input_dim=D, out=H) params (uniform like torch default)
    bound = 1.0 / jnp.sqrt(jnp.float32(D))
    w = jax.random.uniform(kw, (H, D), minval=-bound, maxval=bound, dtype=jnp.float32)
    b = jax.random.uniform(kb, (H,), minval=-bound, maxval=bound, dtype=jnp.float32)

    out, a = hetero_attention(x, masks, w, b)
    jax.block_until_ready((out, a))

    out_ref, a_ref = _reference(x, masks, w, b)
    assert out.shape == out_ref.shape, (out.shape, out_ref.shape)
    assert a.shape == a_ref.shape, (a.shape, a_ref.shape)
    # f32 math; tolerance covers the EUP reciprocal (+ Newton refinement) path.
    assert jnp.allclose(out, out_ref, atol=1e-4, rtol=1e-4), "out mismatch"
    assert jnp.allclose(a, a_ref, atol=1e-4, rtol=1e-4), "attention mismatch"

    print("KERNEL_OK")
</pallas_src>

<mosaic_0001>
module attributes {stable_mosaic.version = 11 : i64} {
  func.func @_hetero_attn_kernel(%arg0: i32, %arg1: memref<1x8x32xf32, #tpu.memory_space<vmem>>, %arg2: memref<1x4x8xbf16, #tpu.memory_space<vmem>>, %arg3: memref<4x32xf32, #tpu.memory_space<vmem>>, %arg4: memref<4x1xf32, #tpu.memory_space<vmem>>, %arg5: memref<1x1x32xf32, #tpu.memory_space<vmem>>, %arg6: memref<1x4x8xf32, #tpu.memory_space<vmem>>) attributes {dimension_semantics = [#tpu.dimension_semantics<parallel>], iteration_bounds = array<i64: 2>, scalar_prefetch = 0 : i64, scratch_operands = 0 : i64, tpu.core_type = #tpu.core_type<tc>, window_params = [{transform_indices = @transform_0, window_bounds = array<i64: 1, 8, 32>}, {transform_indices = @transform_1, window_bounds = array<i64: 1, 4, 8>}, {pipeline_mode = #tpu.pipeline_mode<synchronous>, transform_indices = @transform_2, window_bounds = array<i64: 4, 32>}, {pipeline_mode = #tpu.pipeline_mode<synchronous>, transform_indices = @transform_3, window_bounds = array<i64: 4, 1>}, {transform_indices = @transform_4, window_bounds = array<i64: 1, 1, 32>}, {transform_indices = @transform_5, window_bounds = array<i64: 1, 4, 8>}]} {
    %c0 = arith.constant 0 : index
    %c0_0 = arith.constant 0 : index
    %c0_1 = arith.constant 0 : index
    %0 = vector.load %arg1[%c0, %c0_0, %c0_1] : memref<1x8x32xf32, #tpu.memory_space<vmem>>, vector<1x8x32xf32>
    %c0_2 = arith.constant 0 : index
    %c0_3 = arith.constant 0 : index
    %1 = vector.load %arg3[%c0_2, %c0_3] : memref<4x32xf32, #tpu.memory_space<vmem>>, vector<4x32xf32>
    %2 = vector.shape_cast %1 : vector<4x32xf32> to vector<1x4x32xf32>
    %cst = arith.constant dense<0.000000e+00> : vector<1x4x8xf32>
    %3 = tpu.matmul %2, %0, %cst {dimension_numbers = #tpu.dot_dimension_numbers<[2], [2], [1], [1], [0, 0, 0, 1, 1, 1], [0], [0]>} : vector<1x4x32xf32>, vector<1x8x32xf32>, vector<1x4x8xf32> -> vector<1x4x8xf32>
    %c0_4 = arith.constant 0 : index
    %c0_5 = arith.constant 0 : index
    %4 = vector.load %arg4[%c0_4, %c0_5] : memref<4x1xf32, #tpu.memory_space<vmem>>, vector<4x1xf32>
    %5 = vector.shape_cast %4 : vector<4x1xf32> to vector<1x4x1xf32>
    %6 = vector.broadcast %5 : vector<1x4x1xf32> to vector<1x4x8xf32>
    %7 = arith.addf %3, %6 : vector<1x4x8xf32>
    %c0_6 = arith.constant 0 : index
    %c0_7 = arith.constant 0 : index
    %c0_8 = arith.constant 0 : index
    %8 = vector.load %arg2[%c0_6, %c0_7, %c0_8] : memref<1x4x8xbf16, #tpu.memory_space<vmem>>, vector<1x4x8xbf16>
    %9 = arith.extf %8 : vector<1x4x8xbf16> to vector<1x4x8xf32>
    %cst_9 = arith.constant 5.000000e-01 : f32
    %10 = vector.broadcast %cst_9 : f32 to vector<1x4x8xf32>
    %11 = arith.cmpf ogt, %9, %10 : vector<1x4x8xf32>
    %cst_10 = arith.constant -9.000000e+15 : f32
    %12 = vector.broadcast %cst_10 : f32 to vector<1x4x8xf32>
    %13 = arith.select %11, %7, %12 : vector<1x4x8xi1>, vector<1x4x8xf32>
    %cst_11 = arith.constant dense<0xFF800000> : vector<1x4xf32>
    %14 = vector.multi_reduction <maximumf>, %13, %cst_11 [2] : vector<1x4x8xf32> to vector<1x4xf32>
    %15 = vector.shape_cast %14 : vector<1x4xf32> to vector<1x4x1xf32>
    %16 = vector.broadcast %15 : vector<1x4x1xf32> to vector<1x4x8xf32>
    %17 = arith.subf %13, %16 : vector<1x4x8xf32>
    %18 = math.exp %17 : vector<1x4x8xf32>
    %cst_12 = arith.constant dense<0.000000e+00> : vector<1x4xf32>
    %19 = vector.multi_reduction <add>, %18, %cst_12 [2] : vector<1x4x8xf32> to vector<1x4xf32>
    %20 = vector.shape_cast %19 : vector<1x4xf32> to vector<1x4x1xf32>
    %21 = tpu.reciprocal %20 {approx = true} : vector<1x4x1xf32> -> vector<1x4x1xf32>
    %22 = arith.mulf %20, %21 : vector<1x4x1xf32>
    %cst_13 = arith.constant 2.000000e+00 : f32
    %23 = vector.broadcast %cst_13 : f32 to vector<1x4x1xf32>
    %24 = arith.subf %23, %22 : vector<1x4x1xf32>
    %25 = arith.mulf %21, %24 : vector<1x4x1xf32>
    %26 = vector.broadcast %25 : vector<1x4x1xf32> to vector<1x4x8xf32>
    %27 = arith.mulf %18, %26 : vector<1x4x8xf32>
    %c0_14 = arith.constant 0 : index
    %c0_15 = arith.constant 0 : index
    %c0_16 = arith.constant 0 : index
    %28 = vector.load %arg6[%c0_14, %c0_15, %c0_16] : memref<1x4x8xf32, #tpu.memory_space<vmem>>, vector<1x4x8xf32>
    tpu.vector_store %arg6[%c0_14, %c0_15, %c0_16], %27 {strides = array<i32>} : memref<1x4x8xf32, #tpu.memory_space<vmem>>, vector<1x4x8xf32>,
    %cst_17 = arith.constant dense<0.000000e+00> : vector<1x8xf32>
    %29 = vector.multi_reduction <add>, %27, %cst_17 [1] : vector<1x4x8xf32> to vector<1x8xf32>
    %30 = vector.shape_cast %29 : vector<1x8xf32> to vector<1x1x8xf32>
    %cst_18 = arith.constant 2.500000e-01 : f32
    %31 = vector.broadcast %cst_18 : f32 to vector<1x1x8xf32>
    %32 = arith.mulf %30, %31 : vector<1x1x8xf32>
    %cst_19 = arith.constant dense<0.000000e+00> : vector<1x1x32xf32>
    %33 = tpu.matmul %32, %0, %cst_19 {dimension_numbers = #tpu.dot_dimension_numbers<[2], [1], [1], [2], [0, 0, 0, 1, 1, 2], [0], [0]>} : vector<1x1x8xf32>, vector<1x8x32xf32>, vector<1x1x32xf32> -> vector<1x1x32xf32>
    %c0_20 = arith.constant 0 : index
    %c0_21 = arith.constant 0 : index
    %c0_22 = arith.constant 0 : index
    %34 = vector.load %arg5[%c0_20, %c0_21, %c0_22] : memref<1x1x32xf32, #tpu.memory_space<vmem>>, vector<1x1x32xf32>
    tpu.vector_store %arg5[%c0_20, %c0_21, %c0_22], %33 {strides = array<i32>} : memref<1x1x32xf32, #tpu.memory_space<vmem>>, vector<1x1x32xf32>,
    return
  }
  func.func @transform_0(%arg0: i32) -> (i32, i32, i32) {
    %c0_i32 = arith.constant 0 : i32
    %c0_i32_0 = arith.constant 0 : i32
    %c0_i32_1 = arith.constant 0 : i32
    return %arg0, %c0_i32, %c0_i32_0 : i32, i32, i32
  }
  func.func @transform_1(%arg0: i32) -> (i32, i32, i32) {
    %c0_i32 = arith.constant 0 : i32
    %c0_i32_0 = arith.constant 0 : i32
    %c0_i32_1 = arith.constant 0 : i32
    return %arg0, %c0_i32, %c0_i32_0 : i32, i32, i32
  }
  func.func @transform_2(%arg0: i32) -> (i32, i32) {
    %c0_i32 = arith.constant 0 : i32
    %c0_i32_0 = arith.constant 0 : i32
    %c0_i32_1 = arith.constant 0 : i32
    return %c0_i32, %c0_i32_0 : i32, i32
  }
  func.func @transform_3(%arg0: i32) -> (i32, i32) {
    %c0_i32 = arith.constant 0 : i32
    %c0_i32_0 = arith.constant 0 : i32
    %c0_i32_1 = arith.constant 0 : i32
    return %c0_i32, %c0_i32_0 : i32, i32
  }
  func.func @transform_4(%arg0: i32) -> (i32, i32, i32) {
    %c0_i32 = arith.constant 0 : i32
    %c0_i32_0 = arith.constant 0 : i32
    %c0_i32_1 = arith.constant 0 : i32
    return %arg0, %c0_i32, %c0_i32_0 : i32, i32, i32
  }
  func.func @transform_5(%arg0: i32) -> (i32, i32, i32) {
    %c0_i32 = arith.constant 0 : i32
    %c0_i32_0 = arith.constant 0 : i32
    %c0_i32_1 = arith.constant 0 : i32
    return %arg0, %c0_i32, %c0_i32_0 : i32, i32, i32
  }
}

</mosaic_0001>

<bundles_post_ra>
// kernel: tpu_custom_call.1
= control target key start
LH: loop header
LB: loop body
LE: loop exit
PB: predicated region body
PF: predicated region fallthrough
CT: control target
= control target key end

     0   :  { %11 = vsyncpa [#allocation3], 0  ;;  %s1055_s0 = inlined_call_operand.hbm [shape: f32[2,8,32], index: 0, kind: input, shape index: {}]   ;;  %s1056_s1 = inlined_call_operand.vmem [shape: bf16[2,4,8], index: 1, kind: input, shape index: {}]   ;;  %s1057_s2 = inlined_call_operand.vmem [shape: f32[4,32], index: 2, kind: input, shape index: {}]   ;;  %s1058_s3 = inlined_call_operand.vmem [shape: f32[4,1], index: 3, kind: input, shape index: {}]   ;;  %s1059_s4 = inlined_call_operand.hbm [shape: f32[2,1,32], index: 4, kind: output, shape index: {0}]   ;;  %s1060_s5 = inlined_call_operand.hbm [shape: f32[2,4,8], index: 5, kind: output, shape index: {1}]  }
   0x1   :  { %13 = vsyncpa [#allocation3 + $0x1], 0 }
   0x2   :  { %14 = vsyncpa [#allocation4], 0 }
   0x3   :  { %16 = vsyncpa [#allocation4 + $0x1], 0 }
   0x4   :  { %17 = vsyncpa [#allocation7], 0 }
   0x5   :  { %19 = vsyncpa [#allocation7 + $0x1], 0  ;;  %s853_s18 = smov 0   ;;  %s855_s19 = smov 0  }
   0x6   :  { %s857_s20 = smov 0   ;;  %s859_s21 = smov 0  }
   0x7 LB: > { %s874_s22 = sadd.s32 4294967295, %s815_s21   ;;  %s597_s23 = sadd.s32 4294967294, %s815_s21   ;;  %s815_s21 = sphi %s859_s21, %s1075_s21   ;;  %s811_s20 = sphi %s857_s20, %s1074_s20   ;;  %s807_s19 = sphi %s855_s19, %s1073_s19   ;;  %s803_s18 = sphi %s853_s18, %s1072_s18  }
   0x8   : > { %s878_s24 = sadd.s32 1, %s815_s21   ;;  %s32_s25 = sadd.s32 1, %s811_s20 }
   0x9   : > { %s29_s26 = ssub.s32 %s815_s21, %s878_s24  ;;  %p39_p0 = scmp.ne.s32.totalorder %s811_s20, %s807_s19 }
   0xa   : > { %p30_p1 = scmp.eq.s32.totalorder %s29_s26, 0  ;;  %p40_p2 = scmp.eq.s32.totalorder %s815_s21, 0 }
   0xb   : > { %p45_p3 = scmp.ne.s32.totalorder %s807_s19, %s803_s18  ;;  %p46_p4 = scmp.eq.s32.totalorder %s874_s22, 0 }
   0xc   : > { %s890_s27 = scalar_select %p30_p1, %s811_s20, %s32_s25  }
   0xd   : > { %p892_p5 = por %p40_p2, %p39_p0  ;;  %p896_p6 = por %p46_p4, %p45_p3 }
   0xe   : > { %p137_p7 = scmp.eq.s32.totalorder %s874_s22, 1  ;;  %p143_p8 = scmp.eq.s32.totalorder %s597_s23, 1 }
   0xf   : > { %p645_p10 = scmp.lt.s32.totalorder %s815_s21, 2  ;;  %s195_s7 = sand.u32 1, %s811_s20  }
  0x10   : > { %p903_p11 = por %p137_p7, %p39_p0  ;;  %p907_p12 = por %p143_p8, %p45_p3 }
  0x11   : > { %s601_s8 = sshll.u32 %s815_s21, 7  ;;  %s600_s9 = sshll.u32 %s195_s7, 3 }
  0x12   : > { %s1064_s30 = scalar_select %p903_p11, 1, 0 }
  0x13   : > { %s1065_s6 = scalar_select %p907_p12, 1, 0 }
  0x14   : > { %s916_s12 = scalar_lea.hbm %s1055_s0, %s601_s8  ;;  %s199_s13 = scalar_lea.vmem [#allocation2], %s600_s9 }
  0x15   : > { %s206_s14 = sshll.u32 %s199_s13, 4  ;;  %p920_p13 = pnand %p645_p10, %p892_p5  ;;  %s924_s14 = int_to_ptr.vmem [resolvable:$true] %s206_s14 }
  0x16   : > { %s196_s16 = scalar_lea.sflag [#allocation3], %s195_s7  ;;  %s687_s17 = scalar_lea.hbm %s916_s12, 128 }
  0x17   : > { %p688_p2 = scmp.ne.s32.totalorder %s916_s12, %s687_s17  ;;  %p689_p3 = pneg %p920_p13 }
  0x18   : > { %s692_s26 = scalar_lea.hbm %s1055_s0, 256  ;;  %p693_p5 = scmp.lt.u32.totalorder %s916_s12, %s1055_s0 }
  0x19   : > { %p690_p4 = pnand %p689_p3, %p688_p2  ;;  %p694_p8 = scmp.lt.u32.totalorder %s692_s26, %s687_s17 }
  0x1a   : > { %p696_p9 = scmp.lt.u32.totalorder %s687_s17, %s916_s12 }
  0x1b   : > { %p691_p7 = pneg %p690_p4  ;;  %p695_p10 = por %p694_p8, %p693_p5 }
  0x1d   : > { %p697_p0 = por %p696_p9, %p695_p10 }
  0x1f   : > { %p698_p1 = pnand %p697_p0, %p691_p7 }
  0x21   : > { %701 = shalt.err (!%p698_p1)
}
  0x22   : > { %s702_s7 = scalar_lea.vmem %s924_s14, 128  ;;  %s817_s9 = smov [#allocation2]  }
  0x23   : > { %p703_p2 = scmp.ne.s32.totalorder %s924_s14, %s702_s7  ;;  %s707_s10 = sshll.u32 %s817_s9, 4  ;;  %s708_s10 = int_to_ptr.vmem [resolvable:$false] %s707_s10 }
  0x24   : > { %s709_s11 = scalar_lea.vmem %s708_s10, 256  ;;  %p710_p11 = scmp.lt.s32.totalorder %s924_s14, %s708_s10 }
  0x25   : > { %p705_p4 = pnand %p703_p2, %p689_p3  ;;  %p711_p5 = scmp.lt.s32.totalorder %s709_s11, %s702_s7 }
  0x27   : > { %p706_p12 = pneg %p705_p4  ;;  %p712_p8 = por %p711_p5, %p710_p11 }
  0x29   : > { %p713_p9 = pnand %p712_p8, %p706_p12 }
  0x2b   : > { %716 = shalt.err (!%p713_p9)
}
  0x2c   : > { %637 = dma.hbm_to_vmem [thread:$0]  (!%p920_p13), %s916_s12, 128, %s924_s14, %s196_s16  }
  0x2d   : > { %p1067_p0 = scmp.lt.s32.totalorder %s815_s21, 3  ;;  %p1068_p1 = scmp.ge.s32.totalorder %s815_s21, 1 }
  0x2f   : > { %p219_p3 = pnand %p1068_p1, %p1067_p0 }
  0x30   : > { %s958_s13 = sand.u32 (!%p219_p3), 1, %s807_s19  }
  0x31   : > { %222 = sbr.rel (%p219_p3) target bundleno = 839 (0x347), region = 36  ;;  %s603_s17 = sshll.u32 (!%p219_p3), %s958_s13, 3 }
  0x32   : > { %s225_s23 = scalar_lea.sflag (!%p219_p3), [#allocation3], %s958_s13  ;;  %s228_s25 = scalar_lea.vmem (!%p219_p3), [#allocation2], %s603_s17 }
  0x38   : > { %790 = dma.done.wait (%p896_p6), %s225_s23, 128  }
  0x39   : > { %792 = vsyncadd (%p896_p6), %s225_s23, 4294967168  ;;  %v818_v0 = vmov 0.0   ;;  %vm819_vm0 = vmmov 0   ;;  %v820_v1 = vmov 0   ;;  %vm275_vm1 = vcmask 261120   ;;  %v267_v2 = vld [vmem:[%s228_s25] sm:$0xff] }
  0x3a   : > { %618 = vmatprep.subr.mxu0 %v818_v0  ;;  %620 = vmatprep.mubr.msk.f32.mxu0 %vm819_vm0, %v818_v0  ;;  %v269_v3 = vld [vmem:[%s1058_s3] sm:$0xf]  ;;  %p263_p6 = scmp.lt.s32.totalorder %s874_s22, 1  ;;  %vm356_vm3 = vcmask 60416   ;;  %s604_s9 = sshll.u32 %s958_s13, 2  ;;  %vm380_vm4 = vcmask 64512  }
  0x3b   : > { %682 = vset.pattern.permute.xlu0 %v820_v1  ;;  %623 = vmatprep.subr.mxu1 %v818_v0  ;;  %v268_v4 = vld [vmem:[%s1057_s2] sm:$0xf]  ;;  %s262_s10 = scalar_lea.vmem [#allocation6], %s604_s9  ;;  %s611_s11 = sshll.u32 %s874_s22, 6 }
  0x3c   : > { %625 = vmatprep.mubr.msk.f32.mxu1 %vm819_vm0, %v818_v0  ;;  %619 = vmatpush3.xpose.msk.msra.mxu0 %vm275_vm1, %v267_v2  ;;  %s264_s16 = scalar_select %p263_p6, %s874_s22, 1 }
  0x3d   : > { %272 = vperm.xlu0 %682, %v269_v3   ;;  %624 = vmatpush3.msra.mxu1 %v267_v2  ;;  %s487_s17 = sshll.u32 %s262_s10, 4  ;;  %s986_s12 = scalar_lea.hbm %s1060_s5, %s611_s11  ;;  %s488_s17 = int_to_ptr.vmem [resolvable:$true] %s487_s17 }
  0x3e   : > { %s605_s26 = sshll.u32 %s264_s16, 1  ;;  %s461_s14 = scalar_lea.sflag [#allocation7], %s958_s13 }
  0x3f   : > { %621 = vmatmul.mubr.msk.f32.vlgmr.msra.gmra.mrb[0].mxu0 %vm275_vm1, %v268_v4  ;;  %s266_s7 = scalar_lea.vmem %s1056_s1, %s605_s26  ;;  %s717_s15 = scalar_lea.vmem %s488_s17, 64 }
  0x40   : > { %v352_v5 = vld [vmem:[%s266_s7] sm:$0x3]  ;;  %p718_p11 = scmp.ne.s32.totalorder %s488_s17, %s717_s15  ;;  %p1069_p12 = scmp.ne.s32.totalorder %s1064_s30, 0 }
  0x41   : > { %v353_v6 = vunpack.c.l.bf16 %v352_v5  ;;  %s821_s29 = smov [#allocation6]  }
  0x42   : > { %p719_p13 = pnand %p718_p11, %p1069_p12  ;;  %s721_s16 = sshll.u32 %s821_s29, 4  ;;  %s722_s16 = int_to_ptr.vmem [resolvable:$false] %s721_s16 }
  0x43   : > { %vm354_vm2 = vcmp.gt.f32.partialorder %v353_v6, 0.5  ;;  %s723_s26 = scalar_lea.vmem %s722_s16, 128  ;;  %p724_p10 = scmp.lt.s32.totalorder %s488_s17, %s722_s16 }
  0x44   : > { %p720_p7 = pneg %p719_p13  ;;  %p725_p2 = scmp.lt.s32.totalorder %s723_s26, %s717_s15 }
  0x46   : > { %p726_p4 = por %p725_p2, %p724_p10 }
  0x48   : > { %p727_p5 = pnand %p726_p4, %p720_p7 }
  0xbc   : > { %v273_v7 = vpop.permute.xlu0 %272 }
 0x112   : > { %v348_v8 = vpop.f32.mrb[0].mxu0 }
 0x113   : > { %v349_v9 = vadd.f32 %v348_v8, %v273_v7  ;;  %v622_v10 = vpop.f32.mrb[1].mxu0 }
 0x115   : > { %v355_v11 = vsel %vm354_vm2, %v349_v9, -9e+15 }
 0x116   : > { %v357_v12 = vsel %vm356_vm3, %v355_v11, -inf }
 0x117   : > { %358 = vmax.xlane.f32.xlu0 %v357_v12 }
 0x1a4   : > { %v359_v13 = vpop.xlane.xlu0 %358 }
 0x1a5   : > { %v360_v14 = vsub.f32 %v355_v11, %v359_v13 }
 0x1a7   : > { %v361_v15 = vmul.f32 1.442695, %v360_v14 }
 0x1a9   : > { %683 = vpow2.f32 %v361_v15 }
 0x1b3   : > { %v684_v16 = vpop.eup %683 }
 0x1b4   : > { %v363_v17 = vsel %vm356_vm3, %v684_v16, 0.0 }
 0x1b5   : > { %364 = vadd.xlane.f32.xlu1 %v363_v17 }
 0x242   : > { %v365_v18 = vpop.xlane.xlu1 %364 }
 0x243   : > { %685 = vrcp.f32 %v365_v18 }
 0x24d   : > { %v686_v19 = vpop.eup %685 }
 0x24e   : > { %v367_v20 = vmul.f32 %v686_v19, %v365_v18 }
 0x250   : > { %v368_v21 = vsub.f32 2.0, %v367_v20 }
 0x252   : > { %v369_v22 = vmul.f32 %v686_v19, %v368_v21 }
 0x254   : > { %v370_v23 = vmul.f32 %v684_v16, %v369_v22 }
 0x256   : > { %v372_v24 = vsel %vm356_vm3, %v370_v23, 0.0  ;;  %371 = vst.msk [vmem:[%s262_s10] sm:$0xf] %vm356_vm3, %v370_v23 }
 0x257   : > { %v373_v25 = vrot.slane %v372_v24, 4 }
 0x259   : > { %v374_v26 = vadd.f32 %v373_v25, %v372_v24 }
 0x25b   : > { %v375_v27 = vrot.slane %v374_v26, 2 }
 0x25d   : > { %v376_v28 = vadd.f32 %v375_v27, %v374_v26 }
 0x25f   : > { %v377_v29 = vrot.slane %v376_v28, 1 }
 0x261   : > { %v378_v30 = vadd.f32 %v377_v29, %v376_v28 }
 0x263   : > { %v379_v31 = vmul.f32 0.25, %v378_v30 }
 0x265   : > { %626 = vmatmul.mubr.msk.f32.vlgmr.msra.gmra.mrb[0].mxu1 %vm380_vm4, %v379_v31 }
 0x266   : > { %730 = shalt.err (!%p727_p5)
}
 0x267   : > { %s731_s28 = scalar_lea.hbm %s986_s12, 64  ;;  %s735_s9 = scalar_lea.hbm %s1060_s5, 128 }
 0x268   : > { %p732_p8 = scmp.ne.s32.totalorder %s986_s12, %s731_s28  ;;  %p736_p1 = scmp.lt.u32.totalorder %s986_s12, %s1060_s5 }
 0x269   : > { %p737_p3 = scmp.lt.u32.totalorder %s735_s9, %s731_s28  ;;  %p739_p11 = scmp.lt.u32.totalorder %s731_s28, %s986_s12 }
 0x26a   : > { %p733_p9 = pnand %p732_p8, %p1069_p12 }
 0x26b   : > { %p738_p6 = por %p737_p3, %p736_p1 }
 0x26c   : > { %p734_p0 = pneg %p733_p9 }
 0x26d   : > { %p740_p13 = por %p739_p11, %p738_p6 }
 0x26f   : > { %p741_p7 = pnand %p740_p13, %p734_p0 }
 0x271   : > { %744 = shalt.err (!%p741_p7)
}
 0x272   : > { %631 = dma.vmem_to_hbm [thread:$0]  (%p1069_p12), %s488_s17, 64, %s986_s12, %s461_s14   ;;  %vm454_vm5 = vcmask 253952  }
 0x273   : > { %s610_s23 = sshll.u32 %s874_s22, 4  ;;  %s255_s25 = scalar_lea.vmem [#allocation5], %s958_s13 }
 0x274   : > { %s474_s15 = sshll.u32 %s255_s25, 4  ;;  %s1011_s26 = scalar_lea.hbm %s1059_s4, %s610_s23  ;;  %s1013_s15 = int_to_ptr.vmem [resolvable:$true] %s474_s15 }
 0x275   : > { %s457_s28 = scalar_lea.sflag [#allocation4], %s958_s13  ;;  %s745_s8 = scalar_lea.vmem %s1013_s15, 16 }
 0x276   : > { %p746_p10 = scmp.ne.s32.totalorder %s1013_s15, %s745_s8  ;;  %s822_s22 = smov [#allocation5]  }
 0x277   : > { %s749_s17 = sshll.u32 %s822_s22, 4  ;;  %s750_s17 = int_to_ptr.vmem [resolvable:$false] %s749_s17 }
 0x278   : > { %p747_p2 = pnand %p746_p10, %p1069_p12  ;;  %s751_s12 = scalar_lea.vmem %s750_s17, 32 }
 0x279   : > { %p752_p5 = scmp.lt.s32.totalorder %s1013_s15, %s750_s17  ;;  %p753_p8 = scmp.lt.s32.totalorder %s751_s12, %s745_s8 }
 0x27a   : > { %p748_p4 = pneg %p747_p2 }
 0x27b   : > { %p754_p9 = por %p753_p8, %p752_p5 }
 0x27d   : > { %p755_p0 = pnand %p754_p9, %p748_p4 }
 0x338   : > { %v450_v32 = vpop.f32.mrb[0].mxu1 }
 0x339   : > { %455 = vst.msk [vmem:[%s255_s25] sm:$0x1] %vm454_vm5, %v450_v32  ;;  %v627_v33 = vpop.f32.mrb[1].mxu1 }
 0x33a   : > { %758 = shalt.err (!%p755_p0)
}
 0x33b   : > { %s759_s13 = scalar_lea.hbm %s1011_s26, 16  ;;  %s763_s9 = scalar_lea.hbm %s1059_s4, 32 }
 0x33c   : > { %p760_p1 = scmp.ne.s32.totalorder %s1011_s26, %s759_s13  ;;  %p764_p11 = scmp.lt.u32.totalorder %s1011_s26, %s1059_s4 }
 0x33d   : > { %p765_p13 = scmp.lt.u32.totalorder %s763_s9, %s759_s13  ;;  %p767_p10 = scmp.lt.u32.totalorder %s759_s13, %s1011_s26 }
 0x33e   : > { %p761_p3 = pnand %p760_p1, %p1069_p12 }
 0x33f   : > { %p766_p7 = por %p765_p13, %p764_p11 }
 0x340   : > { %p762_p6 = pneg %p761_p3 }
 0x341   : > { %p768_p2 = por %p767_p10, %p766_p7 }
 0x343   : > { %p769_p4 = pnand %p768_p2, %p762_p6 }
 0x345   : > { %772 = shalt.err (!%p769_p4)
}
 0x346   : > { %630 = dma.vmem_to_hbm [thread:$0]  (%p1069_p12), %s1013_s15, 16, %s1011_s26, %s457_s28  }
 0x347 PF: > { %s499_s23 = sand.u32 1, %s803_s18   ;;  %p1070_p5 = scmp.ne.s32.totalorder %s1065_s6, 0 }
 0x348   : > { %p1071_p8 = scmp.ge.s32.totalorder %s815_s21, 2  ;;  %s500_s25 = scalar_lea.sflag [#allocation4], %s499_s23 }
 0x34a   : > { %p639_p9 = pnand %p1071_p8, %p1070_p5 }
 0x34c   : > { %794 = dma.done.wait (!%p639_p9), %s500_s25, 16  }
 0x34d   : > { %796 = vsyncadd (!%p639_p9), %s500_s25, 4294967280  ;;  %s508_s29 = scalar_lea.sflag [#allocation7], %s499_s23 }
 0x34e   : > { %798 = dma.done.wait (!%p639_p9), %s508_s29, 64  }
 0x34f   : > { %800 = vsyncadd (!%p639_p9), %s508_s29, 4294967232  ;;  %p22_p12 = scmp.ge.s32.totalorder %s878_s24, 4   ;;  %s1072_s18 = smov %s807_s19 }
 0x350   : > { %s1073_s19 = smov %s811_s20  ;;  %s1074_s20 = smov %s890_s27 }
 0x351   : > { %s1075_s21 = smov %s878_s24  ;;  %24 = sbr.rel (!%p22_p12) target bundleno = 7 (0x7), region = 101 }
 0x358   :  { %513 = vsyncpa [#allocation3], 1 }
 0x359   :  { %515 = vsyncpa [#allocation3 + $0x1], 1 }
 0x35a   :  { %516 = vsyncpa [#allocation4], 1 }
 0x35b   :  { %518 = vsyncpa [#allocation4 + $0x1], 1 }
 0x35c   :  { %519 = vsyncpa [#allocation7], 1 }
 0x35d   :  { %521 = vsyncpa [#allocation7 + $0x1], 1 }

</bundles_post_ra>
